<compile_context>
chip_gen: v7x
topology: tpu7x:2x2x1
jax: 0.10.0
libtpu: 0.0.40
codegen_flags: <defaults>
</compile_context>

<pallas_src>
import functools

import jax
import jax.numpy as jnp
from jax.experimental import pallas as pl
from jax.experimental.pallas import tpu as pltpu


# ------------------------------ fused kernel --------------------------------

def _fused_forward_kernel(x_ref, adj_ref, w_ref, b_ref, y_ref):
    """Whole model1_GCN_iSWAP forward for a batch tile, fully VMEM-resident.

    x_ref:   [bt, N, Fin]     batch tile of node features
    adj_ref: [K, N, N]        adjacency stack (shared, loaded once)
    w_ref:   [R, H]           packed weight slab (rows: gc_in|gc1|gc2|fc1|fc2|fc_out)
    b_ref:   [6, H]           packed bias slab (fc_out row zero-padded to H)
    y_ref:   [bt, N, OUT+1]   tanh(fc_out(.)) with omegaQs fused as last column
    """
    bt, n, fin = x_ref.shape
    kord = adj_ref.shape[0]
    hidden = w_ref.shape[-1]
    n_out = y_ref.shape[-1] - 1

    adj = adj_ref[...]                               # [K, N, N], reused by all GCN layers
    x2d = x_ref[...].reshape(bt * n, fin)            # collapse leading dims (minor dim kept)

    # Static, sublane-aligned row offsets into the packed weight slab.
    o_gin = 0
    o_g1 = o_gin + kord * fin
    o_g2 = o_g1 + kord * hidden
    o_f1 = o_g2 + kord * hidden
    o_f2 = o_f1 + hidden
    o_fo = o_f2 + hidden

    def dot(a, b):
        return jnp.dot(a, b, preferred_element_type=jnp.float32)

    def gcn(h2d, w_off, w_rows, b_row):
        # sum_k adj[k] @ h @ W[k] + b  ==  [adj[0]@h | adj[1]@h | ...] @ W_cat + b
        blocks = []
        for b in range(bt):                          # static unroll, bt is tiny
            hb = h2d[b * n:(b + 1) * n, :]           # [N, F] (static slice)
            ah = jnp.concatenate(
                [dot(adj[k], hb) for k in range(kord)], axis=-1)   # [N, K*F]
            blocks.append(ah)
        ah_all = blocks[0] if bt == 1 else jnp.concatenate(blocks, axis=0)  # [bt*N, K*F]
        return dot(ah_all, w_ref[w_off:w_off + w_rows, :]) + b_ref[b_row:b_row + 1, :]

    def fc(h2d, w_off, b_row):
        return dot(h2d, w_ref[w_off:w_off + hidden, :]) + b_ref[b_row:b_row + 1, :]

    h = jnp.tanh(gcn(x2d, o_gin, kord * fin, 0))             # gc_in        [bt*N, H]
    h = jnp.tanh(gcn(h, o_g1, kord * hidden, 1)) + h         # gc1  (+res)
    h = jnp.tanh(gcn(h, o_g2, kord * hidden, 2)) + h         # gc2  (+res)
    h = jnp.tanh(fc(h, o_f1, 3))                             # fc1
    h = jnp.tanh(fc(h, o_f2, 4)) + h                         # fc2  (+res)
    y = jnp.tanh(fc(h, o_fo, 5))                             # fc_out (cols >= n_out are tanh(0), unused)

    omega = x2d[:, fin - 1:fin]                              # omegaQs, verbatim copy
    out2d = jnp.concatenate([y[:, :n_out], omega], axis=-1)  # [bt*N, OUT+1]
    y_ref[...] = out2d.reshape(bt, n, n_out + 1).astype(y_ref.dtype)


def _const_spec(arr):
    """Full-array VMEM block whose block index never changes across the grid."""
    zeros = (0,) * arr.ndim
    return pl.BlockSpec(arr.shape, lambda b, zeros=zeros: zeros)


@functools.partial(jax.jit, static_argnames=("n_out", "batch_tile"))
def model1_gcn_iswap_forward(x, adj, w_slab, b_slab, *, n_out, batch_tile=None):
    """x: [B, N, Fin] f32; adj: [K, N, N] f32 shared across the batch.

    Returns [B, N, n_out + 1] (tanh(fc_out) columns followed by omegaQs).
    """
    bsz, n, fin = x.shape
    bt = bsz if batch_tile is None else batch_tile
    assert bsz % bt == 0, "batch_tile must divide the batch size"

    return pl.pallas_call(
        _fused_forward_kernel,
        out_shape=jax.ShapeDtypeStruct((bsz, n, n_out + 1), jnp.float32),
        grid=(bsz // bt,),
        in_specs=[pl.BlockSpec((bt, n, fin), lambda i: (i, 0, 0)),
                  _const_spec(adj),       # adjacency stack (loaded once)
                  _const_spec(w_slab),    # all weights, one slab
                  _const_spec(b_slab)],   # all biases, one slab
        out_specs=pl.BlockSpec((bt, n, n_out + 1), lambda i: (i, 0, 0)),
        compiler_params=pltpu.CompilerParams(
            dimension_semantics=("parallel",)),
    )(x, adj, w_slab, b_slab)


def pick_batch_tile(bsz):
    """Grid collapse on single-TC chips; 2-way parallel grid on v7x megacore."""
    try:
        kind = jax.devices()[0].device_kind.lower()
    except Exception:
        kind = ""
    if "v7" in kind and bsz % 2 == 0:
        return bsz // 2          # shard the batch across the 2 TensorCores
    return bsz                   # v5e / v6e: one grid step, zero per-step overhead


# --------------------------- parameter construction -------------------------

def init_params(key, inputs, hidden, outputs, max_order=2):
    def gcn_init(k_, fin, fout):
        kw, kb = jax.random.split(k_)
        scale = float(fin) ** -0.5
        w = jax.random.uniform(kw, (max_order, fin, fout), jnp.float32, -scale, scale)
        b = jax.random.uniform(kb, (1, fout), jnp.float32, -scale, scale)
        return w, b

    def linear_init(k_, fin, fout):
        kw, kb = jax.random.split(k_)
        scale = float(fin) ** -0.5
        w = jax.random.uniform(kw, (fin, fout), jnp.float32, -scale, scale)
        b = jax.random.uniform(kb, (1, fout), jnp.float32, -scale, scale)
        return w, b

    ks = jax.random.split(key, 6)
    return {
        "gc_in": gcn_init(ks[0], inputs, hidden),
        "gc1": gcn_init(ks[1], hidden, hidden),
        "gc2": gcn_init(ks[2], hidden, hidden),
        "fc1": linear_init(ks[3], hidden, hidden),
        "fc2": linear_init(ks[4], hidden, hidden),
        "fc_out": linear_init(ks[5], hidden, outputs),
    }


def pack_params(params):
    """One-time host-side packing into 2 VMEM slabs (not in the hot path)."""
    hidden = params["fc1"][0].shape[0]

    def gcn_w(w):                           # [K, Fin, H] -> [K*Fin, H]  (K-sum fold)
        return w.reshape(-1, w.shape[-1])

    def padded(a):                          # pad last dim to H (fc_out width < H)
        return jnp.pad(a, ((0, 0), (0, hidden - a.shape[-1])))

    w_slab = jnp.concatenate([
        gcn_w(params["gc_in"][0]),
        gcn_w(params["gc1"][0]),
        gcn_w(params["gc2"][0]),
        params["fc1"][0],
        params["fc2"][0],
        padded(params["fc_out"][0]),
    ], axis=0)                              # [2*Fin + 4*H + 2*H_pad rows, H]

    b_slab = jnp.concatenate(
        [padded(params[name][1])
         for name in ("gc_in", "gc1", "gc2", "fc1", "fc2", "fc_out")], axis=0)  # [6, H]
    return w_slab, b_slab


# ------------------------------ pure-JAX reference ---------------------------

def reference_forward(params, x, adj):
    hp = jax.lax.Precision.HIGHEST

    def gcn(h, w, b):
        out = b
        for k in range(adj.shape[0]):
            out = out + jnp.einsum("nm,bmf,fo->bno", adj[k], h, w[k], precision=hp)
        return out

    def fc(h, w, b):
        return jnp.einsum("bnf,fo->bno", h, w, precision=hp) + b

    omega_qs = x[:, :, -1:]
    h = jnp.tanh(gcn(x, *params["gc_in"]))
    h = jnp.tanh(gcn(h, *params["gc1"])) + h
    h = jnp.tanh(gcn(h, *params["gc2"])) + h
    h = jnp.tanh(fc(h, *params["fc1"]))
    h = jnp.tanh(fc(h, *params["fc2"])) + h
    y = jnp.tanh(fc(h, *params["fc_out"]))
    return jnp.concatenate([y, omega_qs], axis=-1)


# ----------------------------------- main ------------------------------------

if __name__ == "__main__":
    BATCH, N_NODES, INPUTS, HIDDEN, OUTPUTS, MAX_ORDER = 2, 16, 4, 32, 1, 2

    key = jax.random.PRNGKey(0)
    key, kx, ka = jax.random.split(key, 3)

    # node features [B, N, Fin]; last feature column is omegaQs
    x = jax.random.normal(kx, (BATCH, N_NODES, INPUTS), jnp.float32)

    # adjacency list of length max_order, stacked [K, N, N], row-normalized
    raw = jax.random.uniform(ka, (MAX_ORDER, N_NODES, N_NODES), jnp.float32)
    adj = raw / jnp.sum(raw, axis=-1, keepdims=True)

    params = init_params(key, INPUTS, HIDDEN, OUTPUTS, MAX_ORDER)
    w_slab, b_slab = pack_params(params)
    w_slab, b_slab = jax.block_until_ready((w_slab, b_slab))   # one-time packing

    bt = pick_batch_tile(BATCH)
    out = model1_gcn_iswap_forward(x, adj, w_slab, b_slab,
                                   n_out=OUTPUTS, batch_tile=bt)
    out = jax.block_until_ready(out)

    assert out.shape == (BATCH, N_NODES, OUTPUTS + 1)
    assert bool(jnp.all(jnp.isfinite(out)))
    # first OUTPUTS channels are tanh outputs, last channel is the untouched omegaQs
    assert bool(jnp.all(jnp.abs(out[..., :OUTPUTS]) <= 1.0))
    assert bool(jnp.allclose(out[..., -1], x[..., -1]))

    ref = reference_forward(params, x, adj)
    err = float(jnp.max(jnp.abs(out - ref)))
    assert err < 5e-2, f"max abs err vs reference = {err}"  # tolerant of MXU pass-count diffs
    print("KERNEL_OK")
</pallas_src>

<mosaic_0001>
module attributes {stable_mosaic.version = 11 : i64} {
  func.func @_fused_forward_kernel(%arg0: i32, %arg1: memref<2x16x4xf32, #tpu.memory_space<vmem>>, %arg2: memref<2x16x16xf32, #tpu.memory_space<vmem>>, %arg3: memref<232x32xf32, #tpu.memory_space<vmem>>, %arg4: memref<6x32xf32, #tpu.memory_space<vmem>>, %arg5: memref<2x16x2xf32, #tpu.memory_space<vmem>>) attributes {dimension_semantics = [#tpu.dimension_semantics<parallel>], iteration_bounds = array<i64: 1>, scalar_prefetch = 0 : i64, scratch_operands = 0 : i64, tpu.core_type = #tpu.core_type<tc>, window_params = [{transform_indices = @transform_0, window_bounds = array<i64: 2, 16, 4>}, {pipeline_mode = #tpu.pipeline_mode<synchronous>, transform_indices = @transform_1, window_bounds = array<i64: 2, 16, 16>}, {pipeline_mode = #tpu.pipeline_mode<synchronous>, transform_indices = @transform_2, window_bounds = array<i64: 232, 32>}, {pipeline_mode = #tpu.pipeline_mode<synchronous>, transform_indices = @transform_3, window_bounds = array<i64: 6, 32>}, {transform_indices = @transform_4, window_bounds = array<i64: 2, 16, 2>}]} {
    %c0 = arith.constant 0 : index
    %c0_0 = arith.constant 0 : index
    %c0_1 = arith.constant 0 : index
    %0 = vector.load %arg2[%c0, %c0_0, %c0_1] : memref<2x16x16xf32, #tpu.memory_space<vmem>>, vector<2x16x16xf32>
    %c0_2 = arith.constant 0 : index
    %c0_3 = arith.constant 0 : index
    %c0_4 = arith.constant 0 : index
    %1 = vector.load %arg1[%c0_2, %c0_3, %c0_4] : memref<2x16x4xf32, #tpu.memory_space<vmem>>, vector<2x16x4xf32>
    %2 = vector.shape_cast %1 : vector<2x16x4xf32> to vector<32x4xf32>
    %3 = vector.extract_strided_slice %2 {offsets = [0, 0], sizes = [16, 4], strides = [1, 1]} : vector<32x4xf32> to vector<16x4xf32>
    %4 = vector.extract_strided_slice %0 {offsets = [0, 0, 0], sizes = [1, 16, 16], strides = [1, 1, 1]} : vector<2x16x16xf32> to vector<1x16x16xf32>
    %5 = vector.shape_cast %4 : vector<1x16x16xf32> to vector<16x16xf32>
    %cst = arith.constant dense<0.000000e+00> : vector<16x4xf32>
    %6 = tpu.matmul %5, %3, %cst {dimension_numbers = #tpu.dot_dimension_numbers<[1], [0], [0], [1], [0, 0, 1, 1], [], []>} : vector<16x16xf32>, vector<16x4xf32>, vector<16x4xf32> -> vector<16x4xf32>
    %7 = vector.extract_strided_slice %0 {offsets = [1, 0, 0], sizes = [1, 16, 16], strides = [1, 1, 1]} : vector<2x16x16xf32> to vector<1x16x16xf32>
    %8 = vector.shape_cast %7 : vector<1x16x16xf32> to vector<16x16xf32>
    %cst_5 = arith.constant dense<0.000000e+00> : vector<16x4xf32>
    %9 = tpu.matmul %8, %3, %cst_5 {dimension_numbers = #tpu.dot_dimension_numbers<[1], [0], [0], [1], [0, 0, 1, 1], [], []>} : vector<16x16xf32>, vector<16x4xf32>, vector<16x4xf32> -> vector<16x4xf32>
    %10 = tpu.concatenate %6, %9 in 1 : vector<16x4xf32>, vector<16x4xf32> -> vector<16x8xf32>
    %11 = vector.extract_strided_slice %2 {offsets = [16, 0], sizes = [16, 4], strides = [1, 1]} : vector<32x4xf32> to vector<16x4xf32>
    %12 = vector.extract_strided_slice %0 {offsets = [0, 0, 0], sizes = [1, 16, 16], strides = [1, 1, 1]} : vector<2x16x16xf32> to vector<1x16x16xf32>
    %13 = vector.shape_cast %12 : vector<1x16x16xf32> to vector<16x16xf32>
    %cst_6 = arith.constant dense<0.000000e+00> : vector<16x4xf32>
    %14 = tpu.matmul %13, %11, %cst_6 {dimension_numbers = #tpu.dot_dimension_numbers<[1], [0], [0], [1], [0, 0, 1, 1], [], []>} : vector<16x16xf32>, vector<16x4xf32>, vector<16x4xf32> -> vector<16x4xf32>
    %15 = vector.extract_strided_slice %0 {offsets = [1, 0, 0], sizes = [1, 16, 16], strides = [1, 1, 1]} : vector<2x16x16xf32> to vector<1x16x16xf32>
    %16 = vector.shape_cast %15 : vector<1x16x16xf32> to vector<16x16xf32>
    %cst_7 = arith.constant dense<0.000000e+00> : vector<16x4xf32>
    %17 = tpu.matmul %16, %11, %cst_7 {dimension_numbers = #tpu.dot_dimension_numbers<[1], [0], [0], [1], [0, 0, 1, 1], [], []>} : vector<16x16xf32>, vector<16x4xf32>, vector<16x4xf32> -> vector<16x4xf32>
    %18 = tpu.concatenate %14, %17 in 1 : vector<16x4xf32>, vector<16x4xf32> -> vector<16x8xf32>
    %19 = tpu.concatenate %10, %18 in 0 : vector<16x8xf32>, vector<16x8xf32> -> vector<32x8xf32>
    %c0_8 = arith.constant 0 : index
    %c0_9 = arith.constant 0 : index
    %20 = vector.load %arg3[%c0_8, %c0_9] : memref<232x32xf32, #tpu.memory_space<vmem>>, vector<8x32xf32>
    %cst_10 = arith.constant dense<0.000000e+00> : vector<32x32xf32>
    %21 = tpu.matmul %19, %20, %cst_10 {dimension_numbers = #tpu.dot_dimension_numbers<[1], [0], [0], [1], [0, 0, 1, 1], [], []>} : vector<32x8xf32>, vector<8x32xf32>, vector<32x32xf32> -> vector<32x32xf32>
    %c0_11 = arith.constant 0 : index
    %c0_12 = arith.constant 0 : index
    %22 = vector.load %arg4[%c0_11, %c0_12] : memref<6x32xf32, #tpu.memory_space<vmem>>, vector<1x32xf32>
    %23 = vector.broadcast %22 : vector<1x32xf32> to vector<32x32xf32>
    %24 = arith.addf %21, %23 : vector<32x32xf32>
    %25 = math.tanh %24 : vector<32x32xf32>
    %26 = vector.extract_strided_slice %25 {offsets = [0, 0], sizes = [16, 32], strides = [1, 1]} : vector<32x32xf32> to vector<16x32xf32>
    %27 = vector.extract_strided_slice %0 {offsets = [0, 0, 0], sizes = [1, 16, 16], strides = [1, 1, 1]} : vector<2x16x16xf32> to vector<1x16x16xf32>
    %28 = vector.shape_cast %27 : vector<1x16x16xf32> to vector<16x16xf32>
    %cst_13 = arith.constant dense<0.000000e+00> : vector<16x32xf32>
    %29 = tpu.matmul %28, %26, %cst_13 {dimension_numbers = #tpu.dot_dimension_numbers<[1], [0], [0], [1], [0, 0, 1, 1], [], []>} : vector<16x16xf32>, vector<16x32xf32>, vector<16x32xf32> -> vector<16x32xf32>
    %30 = vector.extract_strided_slice %0 {offsets = [1, 0, 0], sizes = [1, 16, 16], strides = [1, 1, 1]} : vector<2x16x16xf32> to vector<1x16x16xf32>
    %31 = vector.shape_cast %30 : vector<1x16x16xf32> to vector<16x16xf32>
    %cst_14 = arith.constant dense<0.000000e+00> : vector<16x32xf32>
    %32 = tpu.matmul %31, %26, %cst_14 {dimension_numbers = #tpu.dot_dimension_numbers<[1], [0], [0], [1], [0, 0, 1, 1], [], []>} : vector<16x16xf32>, vector<16x32xf32>, vector<16x32xf32> -> vector<16x32xf32>
    %33 = tpu.concatenate %29, %32 in 1 : vector<16x32xf32>, vector<16x32xf32> -> vector<16x64xf32>
    %34 = vector.extract_strided_slice %25 {offsets = [16, 0], sizes = [16, 32], strides = [1, 1]} : vector<32x32xf32> to vector<16x32xf32>
    %35 = vector.extract_strided_slice %0 {offsets = [0, 0, 0], sizes = [1, 16, 16], strides = [1, 1, 1]} : vector<2x16x16xf32> to vector<1x16x16xf32>
    %36 = vector.shape_cast %35 : vector<1x16x16xf32> to vector<16x16xf32>
    %cst_15 = arith.constant dense<0.000000e+00> : vector<16x32xf32>
    %37 = tpu.matmul %36, %34, %cst_15 {dimension_numbers = #tpu.dot_dimension_numbers<[1], [0], [0], [1], [0, 0, 1, 1], [], []>} : vector<16x16xf32>, vector<16x32xf32>, vector<16x32xf32> -> vector<16x32xf32>
    %38 = vector.extract_strided_slice %0 {offsets = [1, 0, 0], sizes = [1, 16, 16], strides = [1, 1, 1]} : vector<2x16x16xf32> to vector<1x16x16xf32>
    %39 = vector.shape_cast %38 : vector<1x16x16xf32> to vector<16x16xf32>
    %cst_16 = arith.constant dense<0.000000e+00> : vector<16x32xf32>
    %40 = tpu.matmul %39, %34, %cst_16 {dimension_numbers = #tpu.dot_dimension_numbers<[1], [0], [0], [1], [0, 0, 1, 1], [], []>} : vector<16x16xf32>, vector<16x32xf32>, vector<16x32xf32> -> vector<16x32xf32>
    %41 = tpu.concatenate %37, %40 in 1 : vector<16x32xf32>, vector<16x32xf32> -> vector<16x64xf32>
    %42 = tpu.concatenate %33, %41 in 0 : vector<16x64xf32>, vector<16x64xf32> -> vector<32x64xf32>
    %c8 = arith.constant 8 : index
    %c0_17 = arith.constant 0 : index
    %43 = vector.load %arg3[%c8, %c0_17] : memref<232x32xf32, #tpu.memory_space<vmem>>, vector<64x32xf32>
    %cst_18 = arith.constant dense<0.000000e+00> : vector<32x32xf32>
    %44 = tpu.matmul %42, %43, %cst_18 {dimension_numbers = #tpu.dot_dimension_numbers<[1], [0], [0], [1], [0, 0, 1, 1], [], []>} : vector<32x64xf32>, vector<64x32xf32>, vector<32x32xf32> -> vector<32x32xf32>
    %c1 = arith.constant 1 : index
    %c0_19 = arith.constant 0 : index
    %45 = vector.load %arg4[%c1, %c0_19] : memref<6x32xf32, #tpu.memory_space<vmem>>, vector<1x32xf32>
    %46 = vector.broadcast %45 : vector<1x32xf32> to vector<32x32xf32>
    %47 = arith.addf %44, %46 : vector<32x32xf32>
    %48 = math.tanh %47 : vector<32x32xf32>
    %49 = arith.addf %48, %25 : vector<32x32xf32>
    %50 = vector.extract_strided_slice %49 {offsets = [0, 0], sizes = [16, 32], strides = [1, 1]} : vector<32x32xf32> to vector<16x32xf32>
    %51 = vector.extract_strided_slice %0 {offsets = [0, 0, 0], sizes = [1, 16, 16], strides = [1, 1, 1]} : vector<2x16x16xf32> to vector<1x16x16xf32>
    %52 = vector.shape_cast %51 : vector<1x16x16xf32> to vector<16x16xf32>
    %cst_20 = arith.constant dense<0.000000e+00> : vector<16x32xf32>
    %53 = tpu.matmul %52, %50, %cst_20 {dimension_numbers = #tpu.dot_dimension_numbers<[1], [0], [0], [1], [0, 0, 1, 1], [], []>} : vector<16x16xf32>, vector<16x32xf32>, vector<16x32xf32> -> vector<16x32xf32>
    %54 = vector.extract_strided_slice %0 {offsets = [1, 0, 0], sizes = [1, 16, 16], strides = [1, 1, 1]} : vector<2x16x16xf32> to vector<1x16x16xf32>
    %55 = vector.shape_cast %54 : vector<1x16x16xf32> to vector<16x16xf32>
    %cst_21 = arith.constant dense<0.000000e+00> : vector<16x32xf32>
    %56 = tpu.matmul %55, %50, %cst_21 {dimension_numbers = #tpu.dot_dimension_numbers<[1], [0], [0], [1], [0, 0, 1, 1], [], []>} : vector<16x16xf32>, vector<16x32xf32>, vector<16x32xf32> -> vector<16x32xf32>
    %57 = tpu.concatenate %53, %56 in 1 : vector<16x32xf32>, vector<16x32xf32> -> vector<16x64xf32>
    %58 = vector.extract_strided_slice %49 {offsets = [16, 0], sizes = [16, 32], strides = [1, 1]} : vector<32x32xf32> to vector<16x32xf32>
    %59 = vector.extract_strided_slice %0 {offsets = [0, 0, 0], sizes = [1, 16, 16], strides = [1, 1, 1]} : vector<2x16x16xf32> to vector<1x16x16xf32>
    %60 = vector.shape_cast %59 : vector<1x16x16xf32> to vector<16x16xf32>
    %cst_22 = arith.constant dense<0.000000e+00> : vector<16x32xf32>
    %61 = tpu.matmul %60, %58, %cst_22 {dimension_numbers = #tpu.dot_dimension_numbers<[1], [0], [0], [1], [0, 0, 1, 1], [], []>} : vector<16x16xf32>, vector<16x32xf32>, vector<16x32xf32> -> vector<16x32xf32>
    %62 = vector.extract_strided_slice %0 {offsets = [1, 0, 0], sizes = [1, 16, 16], strides = [1, 1, 1]} : vector<2x16x16xf32> to vector<1x16x16xf32>
    %63 = vector.shape_cast %62 : vector<1x16x16xf32> to vector<16x16xf32>
    %cst_23 = arith.constant dense<0.000000e+00> : vector<16x32xf32>
    %64 = tpu.matmul %63, %58, %cst_23 {dimension_numbers = #tpu.dot_dimension_numbers<[1], [0], [0], [1], [0, 0, 1, 1], [], []>} : vector<16x16xf32>, vector<16x32xf32>, vector<16x32xf32> -> vector<16x32xf32>
    %65 = tpu.concatenate %61, %64 in 1 : vector<16x32xf32>, vector<16x32xf32> -> vector<16x64xf32>
    %66 = tpu.concatenate %57, %65 in 0 : vector<16x64xf32>, vector<16x64xf32> -> vector<32x64xf32>
    %c72 = arith.constant 72 : index
    %c0_24 = arith.constant 0 : index
    %67 = vector.load %arg3[%c72, %c0_24] : memref<232x32xf32, #tpu.memory_space<vmem>>, vector<64x32xf32>
    %cst_25 = arith.constant dense<0.000000e+00> : vector<32x32xf32>
    %68 = tpu.matmul %66, %67, %cst_25 {dimension_numbers = #tpu.dot_dimension_numbers<[1], [0], [0], [1], [0, 0, 1, 1], [], []>} : vector<32x64xf32>, vector<64x32xf32>, vector<32x32xf32> -> vector<32x32xf32>
    %c2 = arith.constant 2 : index
    %c0_26 = arith.constant 0 : index
    %69 = vector.load %arg4[%c2, %c0_26] : memref<6x32xf32, #tpu.memory_space<vmem>>, vector<1x32xf32>
    %70 = vector.broadcast %69 : vector<1x32xf32> to vector<32x32xf32>
    %71 = arith.addf %68, %70 : vector<32x32xf32>
    %72 = math.tanh %71 : vector<32x32xf32>
    %73 = arith.addf %72, %49 : vector<32x32xf32>
    %c136 = arith.constant 136 : index
    %c0_27 = arith.constant 0 : index
    %74 = vector.load %arg3[%c136, %c0_27] : memref<232x32xf32, #tpu.memory_space<vmem>>, vector<32x32xf32>
    %cst_28 = arith.constant dense<0.000000e+00> : vector<32x32xf32>
    %75 = tpu.matmul %73, %74, %cst_28 {dimension_numbers = #tpu.dot_dimension_numbers<[1], [0], [0], [1], [0, 0, 1, 1], [], []>} : vector<32x32xf32>, vector<32x32xf32>, vector<32x32xf32> -> vector<32x32xf32>
    %c3 = arith.constant 3 : index
    %c0_29 = arith.constant 0 : index
    %76 = vector.load %arg4[%c3, %c0_29] : memref<6x32xf32, #tpu.memory_space<vmem>>, vector<1x32xf32>
    %77 = vector.broadcast %76 : vector<1x32xf32> to vector<32x32xf32>
    %78 = arith.addf %75, %77 : vector<32x32xf32>
    %79 = math.tanh %78 : vector<32x32xf32>
    %c168 = arith.constant 168 : index
    %c0_30 = arith.constant 0 : index
    %80 = vector.load %arg3[%c168, %c0_30] : memref<232x32xf32, #tpu.memory_space<vmem>>, vector<32x32xf32>
    %cst_31 = arith.constant dense<0.000000e+00> : vector<32x32xf32>
    %81 = tpu.matmul %79, %80, %cst_31 {dimension_numbers = #tpu.dot_dimension_numbers<[1], [0], [0], [1], [0, 0, 1, 1], [], []>} : vector<32x32xf32>, vector<32x32xf32>, vector<32x32xf32> -> vector<32x32xf32>
    %c4 = arith.constant 4 : index
    %c0_32 = arith.constant 0 : index
    %82 = vector.load %arg4[%c4, %c0_32] : memref<6x32xf32, #tpu.memory_space<vmem>>, vector<1x32xf32>
    %83 = vector.broadcast %82 : vector<1x32xf32> to vector<32x32xf32>
    %84 = arith.addf %81, %83 : vector<32x32xf32>
    %85 = math.tanh %84 : vector<32x32xf32>
    %86 = arith.addf %85, %79 : vector<32x32xf32>
    %c200 = arith.constant 200 : index
    %c0_33 = arith.constant 0 : index
    %87 = vector.load %arg3[%c200, %c0_33] : memref<232x32xf32, #tpu.memory_space<vmem>>, vector<32x32xf32>
    %cst_34 = arith.constant dense<0.000000e+00> : vector<32x32xf32>
    %88 = tpu.matmul %86, %87, %cst_34 {dimension_numbers = #tpu.dot_dimension_numbers<[1], [0], [0], [1], [0, 0, 1, 1], [], []>} : vector<32x32xf32>, vector<32x32xf32>, vector<32x32xf32> -> vector<32x32xf32>
    %c5 = arith.constant 5 : index
    %c0_35 = arith.constant 0 : index
    %89 = vector.load %arg4[%c5, %c0_35] : memref<6x32xf32, #tpu.memory_space<vmem>>, vector<1x32xf32>
    %90 = vector.broadcast %89 : vector<1x32xf32> to vector<32x32xf32>
    %91 = arith.addf %88, %90 : vector<32x32xf32>
    %92 = math.tanh %91 : vector<32x32xf32>
    %93 = vector.extract_strided_slice %2 {offsets = [0, 3], sizes = [32, 1], strides = [1, 1]} : vector<32x4xf32> to vector<32x1xf32>
    %94 = vector.extract_strided_slice %92 {offsets = [0, 0], sizes = [32, 1], strides = [1, 1]} : vector<32x32xf32> to vector<32x1xf32>
    %95 = tpu.concatenate %94, %93 in 1 : vector<32x1xf32>, vector<32x1xf32> -> vector<32x2xf32>
    %96 = vector.shape_cast %95 : vector<32x2xf32> to vector<2x16x2xf32>
    %c0_36 = arith.constant 0 : index
    %c0_37 = arith.constant 0 : index
    %c0_38 = arith.constant 0 : index
    %97 = vector.load %arg5[%c0_36, %c0_37, %c0_38] : memref<2x16x2xf32, #tpu.memory_space<vmem>>, vector<2x16x2xf32>
    tpu.vector_store %arg5[%c0_36, %c0_37, %c0_38], %96 {strides = array<i32>} : memref<2x16x2xf32, #tpu.memory_space<vmem>>, vector<2x16x2xf32>,
    return
  }
  func.func @transform_0(%arg0: i32) -> (i32, i32, i32) {
    %c0_i32 = arith.constant 0 : i32
    %c0_i32_0 = arith.constant 0 : i32
    %c0_i32_1 = arith.constant 0 : i32
    return %arg0, %c0_i32, %c0_i32_0 : i32, i32, i32
  }
  func.func @transform_1(%arg0: i32) -> (i32, i32, i32) {
    %c0_i32 = arith.constant 0 : i32
    %c0_i32_0 = arith.constant 0 : i32
    %c0_i32_1 = arith.constant 0 : i32
    %c0_i32_2 = arith.constant 0 : i32
    return %c0_i32, %c0_i32_0, %c0_i32_1 : i32, i32, i32
  }
  func.func @transform_2(%arg0: i32) -> (i32, i32) {
    %c0_i32 = arith.constant 0 : i32
    %c0_i32_0 = arith.constant 0 : i32
    %c0_i32_1 = arith.constant 0 : i32
    return %c0_i32, %c0_i32_0 : i32, i32
  }
  func.func @transform_3(%arg0: i32) -> (i32, i32) {
    %c0_i32 = arith.constant 0 : i32
    %c0_i32_0 = arith.constant 0 : i32
    %c0_i32_1 = arith.constant 0 : i32
    return %c0_i32, %c0_i32_0 : i32, i32
  }
  func.func @transform_4(%arg0: i32) -> (i32, i32, i32) {
    %c0_i32 = arith.constant 0 : i32
    %c0_i32_0 = arith.constant 0 : i32
    %c0_i32_1 = arith.constant 0 : i32
    return %arg0, %c0_i32, %c0_i32_0 : i32, i32, i32
  }
}

</mosaic_0001>

<bundles_post_ra>
// kernel: model1_gcn_iswap_forward.1
= control target key start
LH: loop header
LB: loop body
LE: loop exit
PB: predicated region body
PF: predicated region fallthrough
CT: control target
= control target key end

     0   :  { %vm25_vm0 = vcmask 130048   ;;  %s2197_s5 = smov 4   ;;  %vm196_vm1 = vcmask 31744   ;;  %vm365_vm2 = vcmask 64512   ;;  %s2198_s24 = smov 32   ;;  %vm625_vm3 = vcmask 261120   ;;  %s2510_s0 = inlined_call_operand.vmem [shape: f32[2,16,4], index: 0, kind: input, shape index: {}]   ;;  %s2511_s1 = inlined_call_operand.vmem [shape: f32[2,16,16], index: 1, kind: input, shape index: {}]   ;;  %s2512_s2 = inlined_call_operand.vmem [shape: f32[232,32], index: 2, kind: input, shape index: {}]   ;;  %s2513_s3 = inlined_call_operand.vmem [shape: f32[6,32], index: 3, kind: input, shape index: {}]   ;;  %s2514_s4 = inlined_call_operand.vmem [shape: f32[2,16,2], index: 4, kind: output, shape index: {}]  }
   0x1   :  { %v2228_v0 = vld [vmem:[%s2510_s0] sm:$0xff]  ;;  %v2233_v1 = vld [vmem:[%s2510_s0 + $0x8] sm:$0xff]  ;;  %v2249_v4 = vld [vmem:[%s2510_s0 + $0x10] sm:$0xff]  ;;  %vm801_vm4 = vcmask 523264   ;;  %s2199_s15 = smov 126   ;;  %vm1695_vm5 = vcmask 7168  }
   0x2   :  { %v2238_v2 = vld [vmem:[%s2511_s1] sm:$0xff]  ;;  %v2042_v3 = vpack.c.bf16 %v2233_v1, %v2228_v0  ;;  %v2254_v5 = vld [vmem:[%s2510_s0 + $0x18] sm:$0xff]  ;;  %v2261_v7 = vld [vmem:[%s2511_s1 + $0x8] sm:$0xff]  ;;  %vm1700_vm6 = vcmask 15360  }
   0x3   :  { %1868 = vmatprep.mubr.msk.f32.mxu1 %vm25_vm0, %v2238_v2  ;;  %1882 = vmatprep.mubr.msk.f32.mxu0 %vm25_vm0, %v2238_v2  ;;  %v2050_v6 = vpack.c.bf16 %v2254_v5, %v2249_v4  ;;  %v2266_v8 = vld [vmem:[%s2511_s1 + $0x10] sm:$0xff]  ;;  %v2275_v9 = vld [vmem:[%s2511_s1 + $0x18] sm:$0xff]  ;;  %v359_v10 = vld [vmem:[%s2512_s2] sm:$0xff] }
   0x4   :  { %2043 = vmatprep.subr.bf16.mxu1 %v2042_v3  ;;  %v1717_v27 = vld [vmem:[%s2513_s3] ss:$0 sm:$0xff]  ;;  %v788_v42 = vld [vmem:[%s2512_s2 + $0x8] sm:$0xff]  ;;  %v789_v43 = vld [vmem:[%s2512_s2 + $0x10] sm:$0xff] }
   0x5   :  { %2045 = vmatpush3.bf16.msra.mxu1 %v2042_v3  ;;  %2051 = vmatprep.subr.bf16.mxu0 %v2050_v6  ;;  %v790_v44 = vld [vmem:[%s2512_s2 + $0x18] sm:$0xff]  ;;  %v2074_v45 = vpack.c.bf16 %v789_v43, %v788_v42  ;;  %v791_v46 = vld [vmem:[%s2512_s2 + $0x20] sm:$0xff]  ;;  %v792_v48 = vld [vmem:[%s2512_s2 + $0x28] sm:$0xff] }
   0x6   :  { %2047 = vmatprep.subr.bf16.mxu1 %v2042_v3  ;;  %2053 = vmatpush3.bf16.msra.mxu0 %v2050_v6  ;;  %v2078_v47 = vpack.c.bf16 %v791_v46, %v790_v44  ;;  %v793_v49 = vld [vmem:[%s2512_s2 + $0x30] sm:$0xff]  ;;  %v794_v51 = vld [vmem:[%s2512_s2 + $0x38] sm:$0xff]  ;;  %v795_v52 = vld [vmem:[%s2512_s2 + $0x40] sm:$0xff] }
   0x7   :  { %1892 = vmatprep.subr.mxu0 %v359_v10  ;;  %v2082_v50 = vpack.c.bf16 %v793_v49, %v792_v48  ;;  %v2086_v53 = vpack.c.bf16 %v795_v52, %v794_v51 }
   0x8   :  { %1869 = vmatmul.mubr.msk.f32.vlgmr.msra.gmra.mrb[0].mxu1 %vm25_vm0, %v2261_v7 }
   0x9   :  { %2049 = vmatpush3.bf16.msra.mxu1 %v2042_v3  ;;  %1875 = vmatprep.mubr.msk.f32.mxu1 %vm25_vm0, %v2266_v8 }
   0xa   :  { %2055 = vmatprep.subr.bf16.mxu1 %v2050_v6  ;;  %1883 = vmatmul.mubr.msk.f32.vlgmr.msra.gmra.mrb[0].mxu0 %vm25_vm0, %v2261_v7 }
   0xb   :  { %1893 = vmatpush3.msra.mxu0 %v359_v10 }
   0xc   :  { %1876 = vmatmul.mubr.msk.f32.vlgmr.msra.gmra.mrb[2].mxu1 %vm25_vm0, %v2275_v9 }
   0xd   :  { %2057 = vmatpush3.bf16.msra.mxu1 %v2050_v6  ;;  %1889 = vmatprep.mubr.msk.f32.mxu1 %vm25_vm0, %v2266_v8 }
  0x10   :  { %1890 = vmatmul.mubr.msk.f32.vlgmr.msra.gmra.mrb[4].mxu1 %vm25_vm0, %v2275_v9 }
  0x11   :  { %1904 = vmatprep.mubr.msk.f32.mxu1 %vm25_vm0, %v2238_v2 }
  0xdb   :  { %v1870_v11 = vpop.f32.mrb[0].mxu1 }
  0xdc   :  { %v98_v12 = vpop.f32.mrb[1].mxu1 }
  0xdd   :  { %v1884_v13 = vpop.f32.mrb[0].mxu0 }
  0xde   :  { %v265_v14 = vpop.f32.mrb[1].mxu0 }
  0xdf   :  { %v1877_v15 = vpop.f32.mrb[2].mxu1 }
  0xe0   :  { %v179_v16 = vpop.f32.mrb[3].mxu1 }
  0xe1   :  { %190 = vrot.lane.b32.xlu0 %v179_v16, %s2197_s5 }
  0xe3   :  { %v1891_v17 = vpop.f32.mrb[4].mxu1 }
  0xe4   :  { %v340_v18 = vpop.f32.mrb[5].mxu1 }
  0xe5   :  { %192 = vrot.lane.b32.xlu0 %v1877_v15, %s2197_s5  ;;  %351 = vrot.lane.b32.xlu1 %v340_v18, %s2197_s5 }
  0xe9   :  { %353 = vrot.lane.b32.xlu1 %v1891_v17, %s2197_s5 }
 0x153   :  { %v191_v19 = vpop.permute.xlu0 %190 }
 0x154   :  { %v197_v20 = vsel %vm196_vm1, %v98_v12, %v191_v19 }
 0x155   :  { %1894 = vmatprep.mubr.msk.f32.mxu0 %vm365_vm2, %v197_v20 }
 0x157   :  { %v193_v21 = vpop.permute.xlu0 %192  ;;  %v352_v22 = vpop.permute.xlu1 %351 }
 0x158   :  { %v198_v23 = vsel %vm196_vm1, %v1870_v11, %v193_v21  ;;  %v357_v24 = vsel %vm196_vm1, %v265_v14, %v352_v22  ;;  %v1730_v14 = vld [vmem:[%s2513_s3 + $0x1] ss:$0 sm:$0xff] }
 0x159   :  { %1895 = vmatmul.mubr.msk.f32.vlgmr.msra.gmra.mrb[2].mxu0 %vm365_vm2, %v198_v23 }
 0x15a   :  { %1897 = vmatprep.mubr.msk.f32.mxu0 %vm365_vm2, %v357_v24 }
 0x15b   :  { %v354_v25 = vpop.permute.xlu1 %353 }
 0x15c   :  { %v358_v26 = vsel %vm196_vm1, %v1884_v13, %v354_v25 }
 0x15d   :  { %1898 = vmatmul.mubr.msk.f32.gmra.mrb[4].mxu0 %vm365_vm2, %v358_v26 }
 0x15e   :  { %1918 = vmatprep.mubr.msk.f32.mxu0 %vm25_vm0, %v2238_v2 }
 0x22c   :  { %v1896_v28 = vpop.f32.mrb[2].mxu0 }
 0x22d   :  { %v450_v29 = vadd.f32 %v1896_v28, %v1717_v27  ;;  %v444_v30 = vpop.f32.mrb[3].mxu0 }
 0x22e   :  { %v445_v31 = vadd.f32 %v1717_v27, %v444_v30 }
 0x22f   :  { %2149 = vtanh.f32 %v450_v29 }
 0x230   :  { %2151 = vtanh.f32 %v445_v31  ;;  %v1899_v32 = vpop.f32.mrb[4].mxu0 }
 0x231   :  { %v460_v33 = vadd.f32 %v1899_v32, %v1717_v27  ;;  %v454_v34 = vpop.f32.mrb[5].mxu0 }
 0x232   :  { %v455_v35 = vadd.f32 %v1717_v27, %v454_v34  ;;  %v1228_v34 = vld [vmem:[%s2512_s2 + $0x50] sm:$0xff] }
 0x233   :  { %2153 = vtanh.f32 %v460_v33  ;;  %v1227_v33 = vld [vmem:[%s2512_s2 + $0x48] sm:$0xff] }
 0x234   :  { %2155 = vtanh.f32 %v455_v35 }
 0x239   :  { %v2295_v36 = vpop.eup %2149 }
 0x23a   :  { %v2297_v37 = vpop.eup %2151 }
 0x23b   :  { %v2058_v38 = vpack.c.bf16 %v2295_v36, %v2297_v37 }
 0x23d   :  { %v2301_v39 = vpop.eup %2153  ;;  %2059 = vmatprep.subr.bf16.mxu1 %v2058_v38 }
 0x23e   :  { %v2303_v40 = vpop.eup %2155  ;;  %2061 = vmatpush3.bf16.msra.mxu1 %v2058_v38 }
 0x23f   :  { %2063 = vmatprep.subr.bf16.mxu1 %v2058_v38  ;;  %v2066_v41 = vpack.c.bf16 %v2301_v39, %v2303_v40 }
 0x241   :  { %1905 = vmatmul.mubr.msk.f32.vlgmr.msra.gmra.mrb[6].mxu1 %vm25_vm0, %v2261_v7  ;;  %2067 = vmatprep.subr.bf16.mxu0 %v2066_v41 }
 0x242   :  { %2065 = vmatpush3.bf16.msra.mxu1 %v2058_v38  ;;  %2069 = vmatpush3.bf16.msra.mxu0 %v2066_v41  ;;  %v1233_v38 = vld [vmem:[%s2512_s2 + $0x78] sm:$0xff] }
 0x243   :  { %2071 = vmatprep.subr.bf16.mxu1 %v2066_v41  ;;  %1911 = vmatprep.mubr.msk.f32.mxu1 %vm25_vm0, %v2266_v8 }
 0x244   :  { %2075 = vmatprep.subr.bf16.mxu0 %v2074_v45 }
 0x245   :  { %1912 = vmatmul.mubr.msk.f32.vlgmr.msra.gmra.mrb[8].mxu1 %vm25_vm0, %v2275_v9  ;;  %1919 = vmatmul.mubr.msk.f32.vlgmr.msra.gmra.mrb[6].mxu0 %vm25_vm0, %v2261_v7 }
 0x246   :  { %2073 = vmatpush3.bf16.msra.mxu1 %v2066_v41  ;;  %1925 = vmatprep.mubr.msk.f32.mxu1 %vm25_vm0, %v2266_v8 }
 0x247   :  { %2077 = vmatpush3.bf16.msra.mxu0 %v2074_v45 }
 0x248   :  { %2079 = vmatprep.subr.bf16.mxu0 %v2078_v47 }
 0x249   :  { %1926 = vmatmul.mubr.msk.f32.vlgmr.msra.gmra.mrb[10].mxu1 %vm25_vm0, %v2275_v9 }
 0x24a   :  { %1954 = vmatprep.mubr.msk.f32.mxu1 %vm25_vm0, %v2238_v2 }
 0x24b   :  { %2081 = vmatpush3.bf16.msra.mxu0 %v2078_v47 }
 0x24c   :  { %2083 = vmatprep.subr.bf16.mxu0 %v2082_v50 }
 0x24f   :  { %2085 = vmatpush3.bf16.msra.mxu0 %v2082_v50 }
 0x250   :  { %2087 = vmatprep.subr.bf16.mxu0 %v2086_v53 }
 0x253   :  { %2089 = vmatpush3.bf16.msra.mxu0 %v2086_v53 }
 0x314   :  { %v1906_v54 = vpop.f32.mrb[6].mxu1 }
 0x315   :  { %v533_v55 = vpop.f32.mrb[7].mxu1 }
 0x318   :  { %v1913_v56 = vpop.f32.mrb[8].mxu1  ;;  %v1920_v57 = vpop.f32.mrb[6].mxu0 }
 0x319   :  { %621 = vrot.lane.b32.xlu1 %v1913_v56, %s2198_s24  ;;  %v608_v58 = vpop.f32.mrb[9].mxu1  ;;  %v694_v59 = vpop.f32.mrb[7].mxu0 }
 0x31a   :  { %619 = vrot.lane.b32.xlu0 %v608_v58, %s2198_s24  ;;  %v1346_v58 = vld [vmem:[%s2512_s2 + $0x90] sm:$0xff] }
 0x31c   :  { %v1927_v60 = vpop.f32.mrb[10].mxu1 }
 0x31d   :  { %v769_v61 = vpop.f32.mrb[11].mxu1  ;;  %782 = vrot.lane.b32.xlu1 %v1927_v60, %s2198_s24  ;;  %v1347_v60 = vld [vmem:[%s2512_s2 + $0x98] sm:$0xff] }
 0x31e   :  { %780 = vrot.lane.b32.xlu0 %v769_v61, %s2198_s24  ;;  %v1348_v61 = vld [vmem:[%s2512_s2 + $0xa0] sm:$0xff] }
 0x38b   :  { %v622_v62 = vpop.permute.xlu1 %621 }
 0x38c   :  { %v620_v63 = vpop.permute.xlu0 %619  ;;  %v627_v6 = vsel %vm625_vm3, %v1906_v54, %v622_v62  ;;  %v2126_v62 = vpack.c.bf16 %v1348_v61, %v1347_v60 }
 0x38d   :  { %v626_v3 = vsel %vm625_vm3, %v533_v55, %v620_v63  ;;  %v1743_v63 = vld [vmem:[%s2513_s3 + $0x2] ss:$0 sm:$0xff] }
 0x38e   :  { %1944 = vmatprep.mubr.msk.f32.mxu0 %vm801_vm4, %v626_v3 }
 0x38f   :  { %1945 = vmatmul.mubr.msk.f32.vlgmr.msra.gmra.mrb[8].mxu0 %vm801_vm4, %v627_v6  ;;  %v783_v10 = vpop.permute.xlu1 %782 }
 0x390   :  { %v781_v11 = vpop.permute.xlu0 %780  ;;  %v787_v12 = vsel %vm625_vm3, %v1920_v57, %v783_v10  ;;  %v1345_v57 = vld [vmem:[%s2512_s2 + $0x88] sm:$0xff] }
 0x391   :  { %v786_v13 = vsel %vm625_vm3, %v694_v59, %v781_v11  ;;  %v2122_v59 = vpack.c.bf16 %v1346_v58, %v1345_v57  ;;  %v1758_v58 = vld [vmem:[%s2513_s3 + $0x5] ss:$0 sm:$0xff] }
 0x392   :  { %1947 = vmatprep.mubr.msk.f32.mxu0 %vm801_vm4, %v786_v13 }
 0x393   :  { %1948 = vmatmul.mubr.msk.f32.gmra.mrb[10].mxu0 %vm801_vm4, %v787_v12 }
 0x462   :  { %v1946_v15 = vpop.f32.mrb[8].mxu0 }
 0x463   :  { %v886_v16 = vadd.f32 %v1946_v15, %v1730_v14  ;;  %v880_v17 = vpop.f32.mrb[9].mxu0 }
 0x464   :  { %v881_v18 = vadd.f32 %v1730_v14, %v880_v17 }
 0x465   :  { %2157 = vtanh.f32 %v886_v16 }
 0x466   :  { %2159 = vtanh.f32 %v881_v18  ;;  %v1949_v19 = vpop.f32.mrb[10].mxu0 }
 0x467   :  { %v896_v20 = vadd.f32 %v1949_v19, %v1730_v14  ;;  %v890_v21 = vpop.f32.mrb[11].mxu0 }
 0x468   :  { %v891_v22 = vadd.f32 %v1730_v14, %v890_v21 }
 0x469   :  { %2161 = vtanh.f32 %v896_v20 }
 0x46a   :  { %2163 = vtanh.f32 %v891_v22 }
 0x46f   :  { %v2158_v23 = vpop.eup %2157 }
 0x470   :  { %v2160_v24 = vpop.eup %2159  ;;  %v2361_v25 = vadd.f32 %v2158_v23, %v2295_v36  ;;  %v1232_v36 = vld [vmem:[%s2512_s2 + $0x70] sm:$0xff] }
 0x471   :  { %v2364_v26 = vadd.f32 %v2160_v24, %v2297_v37  ;;  %v1455_v24 = vld [vmem:[%s2512_s2 + $0xa8] sm:$0xff] }
 0x473   :  { %v2162_v27 = vpop.eup %2161  ;;  %v2090_v28 = vpack.c.bf16 %v2361_v25, %v2364_v26 }
 0x474   :  { %v2164_v29 = vpop.eup %2163  ;;  %v2372_v31 = vadd.f32 %v2162_v27, %v2301_v39  ;;  %v1234_v39 = vld [vmem:[%s2512_s2 + $0x80] sm:$0xff]  ;;  %v1457_v27 = vld [vmem:[%s2512_s2 + $0xb8] sm:$0xff] }
 0x475   :  { %2091 = vmatprep.subr.bf16.mxu1 %v2090_v28  ;;  %v2369_v30 = vadd.f32 %v2164_v29, %v2303_v40  ;;  %v2118_v40 = vpack.c.bf16 %v1234_v39, %v1233_v38  ;;  %v1569_v39 = vld [vmem:[%s2512_s2 + $0xc8] sm:$0xff] }
 0x476   :  { %2093 = vmatpush3.bf16.msra.mxu1 %v2090_v28 }
 0x477   :  { %2095 = vmatprep.subr.bf16.mxu1 %v2090_v28  ;;  %v2098_v32 = vpack.c.bf16 %v2372_v31, %v2369_v30 }
 0x479   :  { %1955 = vmatmul.mubr.msk.f32.vlgmr.msra.gmra.mrb[12].mxu1 %vm25_vm0, %v2261_v7 }
 0x47a   :  { %2097 = vmatpush3.bf16.msra.mxu1 %v2090_v28  ;;  %1961 = vmatprep.mubr.msk.f32.mxu1 %vm25_vm0, %v2266_v8  ;;  %v1458_v28 = vld [vmem:[%s2512_s2 + $0xc0] sm:$0xff] }
 0x47b   :  { %2099 = vmatprep.subr.bf16.mxu1 %v2098_v32  ;;  %v2134_v29 = vpack.c.bf16 %v1458_v28, %v1457_v27 }
 0x47d   :  { %1962 = vmatmul.mubr.msk.f32.vlgmr.msra.gmra.mrb[14].mxu1 %vm25_vm0, %v2275_v9 }
 0x47e   :  { %2101 = vmatpush3.bf16.msra.mxu1 %v2098_v32  ;;  %1968 = vmatprep.mubr.msk.f32.mxu1 %vm25_vm0, %v2238_v2  ;;  %v1229_v2 = vld [vmem:[%s2512_s2 + $0x58] sm:$0xff] }
 0x47f   :  { %2103 = vmatprep.subr.bf16.mxu1 %v2098_v32 }
 0x481   :  { %1969 = vmatmul.mubr.msk.f32.vlgmr.msra.gmra.mrb[16].mxu1 %vm25_vm0, %v2261_v7  ;;  %v2106_v7 = vpack.c.bf16 %v1228_v34, %v1227_v33 }
 0x482   :  { %2105 = vmatpush3.bf16.msra.mxu1 %v2098_v32  ;;  %1975 = vmatprep.mubr.msk.f32.mxu1 %vm25_vm0, %v2266_v8  ;;  %v1230_v8 = vld [vmem:[%s2512_s2 + $0x60] sm:$0xff] }
 0x483   :  { %v2110_v35 = vpack.c.bf16 %v1230_v8, %v1229_v2  ;;  %2107 = vmatprep.subr.bf16.mxu0 %v2106_v7  ;;  %2123 = vmatprep.subr.bf16.mxu1 %v2122_v59 }
 0x484   :  { %2109 = vmatpush3.bf16.msra.mxu0 %v2106_v7 }
 0x485   :  { %1976 = vmatmul.mubr.msk.f32.vlgmr.msra.gmra.mrb[18].mxu1 %vm25_vm0, %v2275_v9  ;;  %v1231_v9 = vld [vmem:[%s2512_s2 + $0x68] sm:$0xff]  ;;  %2111 = vmatprep.subr.bf16.mxu0 %v2110_v35 }
 0x486   :  { %v2114_v37 = vpack.c.bf16 %v1232_v36, %v1231_v9  ;;  %2125 = vmatpush3.bf16.msra.mxu1 %v2122_v59 }
 0x487   :  { %2127 = vmatprep.subr.bf16.mxu1 %v2126_v62 }
 0x488   :  { %2113 = vmatpush3.bf16.msra.mxu0 %v2110_v35 }
 0x489   :  { %2115 = vmatprep.subr.bf16.mxu0 %v2114_v37 }
 0x48a   :  { %2129 = vmatpush3.bf16.msra.mxu1 %v2126_v62 }
 0x48c   :  { %2117 = vmatpush3.bf16.msra.mxu0 %v2114_v37 }
 0x48d   :  { %2119 = vmatprep.subr.bf16.mxu0 %v2118_v40 }
 0x490   :  { %2121 = vmatpush3.bf16.msra.mxu0 %v2118_v40  ;;  %v1570_v40 = vld [vmem:[%s2512_s2 + $0xd0] sm:$0xff] }
 0x54c   :  { %v1956_v41 = vpop.f32.mrb[12].mxu1 }
 0x54d   :  { %v973_v42 = vpop.f32.mrb[13].mxu1 }
 0x550   :  { %v1963_v43 = vpop.f32.mrb[14].mxu1 }
 0x551   :  { %1061 = vrot.lane.b32.xlu1 %v1963_v43, %s2198_s24  ;;  %v1048_v44 = vpop.f32.mrb[15].mxu1  ;;  %v1572_v43 = vld [vmem:[%s2512_s2 + $0xe0] sm:$0xff] }
 0x552   :  { %1059 = vrot.lane.b32.xlu0 %v1048_v44, %s2198_s24 }
 0x554   :  { %v1970_v45 = vpop.f32.mrb[16].mxu1 }
 0x555   :  { %v1133_v46 = vpop.f32.mrb[17].mxu1 }
 0x558   :  { %v1977_v47 = vpop.f32.mrb[18].mxu1 }
 0x559   :  { %1221 = vrot.lane.b32.xlu1 %v1977_v47, %s2198_s24  ;;  %v1208_v48 = vpop.f32.mrb[19].mxu1 }
 0x55a   :  { %1219 = vrot.lane.b32.xlu0 %v1208_v48, %s2198_s24 }
 0x55d   :  { %1685 = vrot.lane.b32.xlu1 %v2233_v1, %s2199_s15 }
 0x55e   :  { %1683 = vrot.lane.b32.xlu0 %v2228_v0, %s2199_s15 }
 0x561   :  { %1689 = vrot.lane.b32.xlu1 %v2254_v5, %s2199_s15 }
 0x562   :  { %1687 = vrot.lane.b32.xlu0 %v2249_v4, %s2199_s15 }
 0x5c3   :  { %v1062_v49 = vpop.permute.xlu1 %1061 }
 0x5c4   :  { %v1060_v50 = vpop.permute.xlu0 %1059  ;;  %v1066_v52 = vsel %vm625_vm3, %v1956_v41, %v1062_v49  ;;  %v2138_v41 = vpack.c.bf16 %v1570_v40, %v1569_v39 }
 0x5c5   :  { %v1065_v51 = vsel %vm625_vm3, %v973_v42, %v1060_v50  ;;  %v1571_v42 = vld [vmem:[%s2512_s2 + $0xd8] sm:$0xff] }
 0x5c6   :  { %1994 = vmatprep.mubr.msk.f32.mxu0 %vm801_vm4, %v1065_v51  ;;  %2139 = vmatprep.subr.bf16.mxu0 %v2138_v41  ;;  %v2142_v44 = vpack.c.bf16 %v1572_v43, %v1571_v42 }
 0x5c7   :  { %1995 = vmatmul.mubr.msk.f32.vlgmr.msra.gmra.mrb[12].mxu0 %vm801_vm4, %v1066_v52 }
 0x5c8   :  { %2141 = vmatpush3.bf16.msra.mxu0 %v2138_v41 }
 0x5c9   :  { %2143 = vmatprep.subr.bf16.mxu0 %v2142_v44 }
 0x5cb   :  { %v1222_v53 = vpop.permute.xlu1 %1221 }
 0x5cc   :  { %v1220_v54 = vpop.permute.xlu0 %1219  ;;  %v1226_v56 = vsel %vm625_vm3, %v1970_v45, %v1222_v53  ;;  %2145 = vmatpush3.bf16.msra.mxu0 %v2142_v44  ;;  %v1753_v45 = vld [vmem:[%s2513_s3 + $0x4] ss:$0 sm:$0xff] }
 0x5cd   :  { %v1225_v55 = vsel %vm625_vm3, %v1133_v46, %v1220_v54 }
 0x5ce   :  { %1997 = vmatprep.mubr.msk.f32.mxu0 %vm801_vm4, %v1225_v55 }
 0x5cf   :  { %1998 = vmatmul.mubr.msk.f32.gmra.mrb[14].mxu0 %vm801_vm4, %v1226_v56 }
 0x69a   :  { %v1996_v3 = vpop.f32.mrb[12].mxu0 }
 0x69b   :  { %v1324_v6 = vadd.f32 %v1996_v3, %v1743_v63  ;;  %v1318_v10 = vpop.f32.mrb[13].mxu0 }
 0x69c   :  { %v1319_v11 = vadd.f32 %v1743_v63, %v1318_v10 }
 0x69d   :  { %2165 = vtanh.f32 %v1324_v6 }
 0x69e   :  { %2167 = vtanh.f32 %v1319_v11  ;;  %v1686_v11 = vpop.permute.xlu1 %1685 }
 0x6a2   :  { %v1999_v12 = vpop.f32.mrb[14].mxu0 }
 0x6a3   :  { %v1334_v13 = vadd.f32 %v1999_v12, %v1743_v63  ;;  %v1328_v14 = vpop.f32.mrb[15].mxu0  ;;  %v1684_v12 = vpop.permute.xlu0 %1683 }
 0x6a4   :  { %v1329_v15 = vadd.f32 %v1743_v63, %v1328_v14 }
 0x6a5   :  { %2169 = vtanh.f32 %v1334_v13 }
 0x6a6   :  { %2171 = vtanh.f32 %v1329_v15 }
 0x6a7   :  { %v2166_v16 = vpop.eup %2165 }
 0x6a8   :  { %v2168_v17 = vpop.eup %2167  ;;  %v1342_v19 = vadd.f32 %v2166_v16, %v2361_v25  ;;  %v1456_v25 = vld [vmem:[%s2512_s2 + $0xb0] sm:$0xff] }
 0x6a9   :  { %v1341_v18 = vadd.f32 %v2168_v17, %v2364_v26  ;;  %v2130_v26 = vpack.c.bf16 %v1456_v25, %v1455_v24  ;;  %v1690_v17 = vpop.permute.xlu1 %1689 }
 0x6ab   :  { %2008 = vmatprep.mubr.msk.f32.mxu1 %vm625_vm3, %v1341_v18  ;;  %2131 = vmatprep.subr.bf16.mxu1 %v2130_v26  ;;  %v1688_v18 = vpop.permute.xlu0 %1687 }
 0x6ac   :  { %2009 = vmatmul.mubr.msk.f32.vlgmr.msra.gmra.mrb[20].mxu1 %vm625_vm3, %v1342_v19 }
 0x6ad   :  { %2133 = vmatpush3.bf16.msra.mxu1 %v2130_v26 }
 0x6ae   :  { %2135 = vmatprep.subr.bf16.mxu1 %v2134_v29 }
 0x6af   :  { %v2170_v20 = vpop.eup %2169 }
 0x6b0   :  { %v2172_v21 = vpop.eup %2171  ;;  %v1344_v23 = vadd.f32 %v2170_v20, %v2372_v31 }
 0x6b1   :  { %v1343_v22 = vadd.f32 %v2172_v21, %v2369_v30  ;;  %2137 = vmatpush3.bf16.msra.mxu1 %v2134_v29  ;;  %v1748_v30 = vld [vmem:[%s2513_s3 + $0x3] ss:$0 sm:$0xff] }
 0x6b3   :  { %2011 = vmatprep.mubr.msk.f32.mxu1 %vm625_vm3, %v1343_v22 }
 0x6b4   :  { %2012 = vmatmul.mubr.msk.f32.gmra.mrb[22].mxu1 %vm625_vm3, %v1344_v23 }
 0x77f   :  { %v2010_v31 = vpop.f32.mrb[20].mxu1 }
 0x780   :  { %v1438_v32 = vadd.f32 %v2010_v31, %v1748_v30  ;;  %v1432_v33 = vpop.f32.mrb[21].mxu1 }
 0x781   :  { %v1433_v34 = vadd.f32 %v1748_v30, %v1432_v33 }
 0x783   :  { %2173 = vtanh.f32 %v1433_v34 }
 0x784   :  { %2175 = vtanh.f32 %v1438_v32 }
 0x787   :  { %v2013_v2 = vpop.f32.mrb[22].mxu1 }
 0x788   :  { %v1448_v7 = vadd.f32 %v2013_v2, %v1748_v30  ;;  %v1442_v8 = vpop.f32.mrb[23].mxu1 }
 0x789   :  { %v1443_v35 = vadd.f32 %v1748_v30, %v1442_v8 }
 0x78b   :  { %2177 = vtanh.f32 %v1443_v35 }
 0x78c   :  { %2179 = vtanh.f32 %v1448_v7 }
 0x78d   :  { %v2174_v9 = vpop.eup %2173 }
 0x78e   :  { %v2176_v36 = vpop.eup %2175  ;;  %2022 = vmatprep.mubr.msk.f32.mxu1 %vm625_vm3, %v2174_v9 }
 0x78f   :  { %2023 = vmatmul.mubr.msk.f32.vlgmr.msra.gmra.mrb[24].mxu1 %vm625_vm3, %v2176_v36 }
 0x795   :  { %v2178_v37 = vpop.eup %2177 }
 0x796   :  { %v2180_v38 = vpop.eup %2179  ;;  %2025 = vmatprep.mubr.msk.f32.mxu1 %vm625_vm3, %v2178_v37 }
 0x797   :  { %2026 = vmatmul.mubr.msk.f32.gmra.mrb[26].mxu1 %vm625_vm3, %v2180_v38 }
 0x862   :  { %v2024_v46 = vpop.f32.mrb[24].mxu1 }
 0x863   :  { %v1548_v47 = vadd.f32 %v2024_v46, %v1753_v45  ;;  %v1542_v48 = vpop.f32.mrb[25].mxu1 }
 0x864   :  { %v1543_v49 = vadd.f32 %v1753_v45, %v1542_v48 }
 0x865   :  { %2181 = vtanh.f32 %v1548_v47 }
 0x866   :  { %2183 = vtanh.f32 %v1543_v49 }
 0x86a   :  { %v2027_v50 = vpop.f32.mrb[26].mxu1 }
 0x86b   :  { %v1558_v51 = vadd.f32 %v2027_v50, %v1753_v45  ;;  %v1552_v52 = vpop.f32.mrb[27].mxu1 }
 0x86c   :  { %v1553_v1 = vadd.f32 %v1753_v45, %v1552_v52 }
 0x86d   :  { %2185 = vtanh.f32 %v1558_v51 }
 0x86e   :  { %2187 = vtanh.f32 %v1553_v1 }
 0x86f   :  { %v2182_v0 = vpop.eup %2181 }
 0x870   :  { %v2184_v5 = vpop.eup %2183  ;;  %v1566_v4 = vadd.f32 %v2182_v0, %v2176_v36 }
 0x871   :  { %v1565_v53 = vadd.f32 %v2184_v5, %v2174_v9 }
 0x873   :  { %2036 = vmatprep.mubr.msk.f32.mxu0 %vm625_vm3, %v1565_v53 }
 0x874   :  { %2037 = vmatmul.mubr.msk.f32.vlgmr.msra.gmra.mrb[16].mxu0 %vm625_vm3, %v1566_v4 }
 0x877   :  { %v2186_v54 = vpop.eup %2185 }
 0x878   :  { %v2188_v55 = vpop.eup %2187  ;;  %v1568_v57 = vadd.f32 %v2186_v54, %v2180_v38 }
 0x879   :  { %v1567_v56 = vadd.f32 %v2188_v55, %v2178_v37 }
 0x87b   :  { %2039 = vmatprep.mubr.msk.f32.mxu0 %vm625_vm3, %v1567_v56 }
 0x87c   :  { %2040 = vmatmul.mubr.msk.f32.gmra.mrb[18].mxu0 %vm625_vm3, %v1568_v57 }
 0x947   :  { %v2038_v59 = vpop.f32.mrb[16].mxu0 }
 0x948   :  { %v1662_v60 = vadd.f32 %v2038_v59, %v1758_v58  ;;  %v1656_v61 = vpop.f32.mrb[17].mxu0 }
 0x949   :  { %v1657_v62 = vadd.f32 %v1758_v58, %v1656_v61 }
 0x94a   :  { %2189 = vtanh.f32 %v1662_v60 }
 0x94b   :  { %2191 = vtanh.f32 %v1657_v62 }
 0x94f   :  { %v2041_v63 = vpop.f32.mrb[18].mxu0 }
 0x950   :  { %v1672_v3 = vadd.f32 %v2041_v63, %v1758_v58  ;;  %v1666_v6 = vpop.f32.mrb[19].mxu0 }
 0x951   :  { %v1667_v10 = vadd.f32 %v1758_v58, %v1666_v6 }
 0x952   :  { %2193 = vtanh.f32 %v1672_v3 }
 0x953   :  { %2195 = vtanh.f32 %v1667_v10 }
 0x954   :  { %v2190_v13 = vpop.eup %2189 }
 0x955   :  { %v2192_v14 = vpop.eup %2191  ;;  %v1697_v15 = vsel %vm1695_vm5, %v2190_v13, %v1686_v11 }
 0x956   :  { %1702 = vst.msk [vmem:[%s2514_s4 + $0x8] sm:$0xff] %vm1700_vm6, %v1697_v15  ;;  %v1696_v16 = vsel %vm1695_vm5, %v2192_v14, %v1684_v12 }
 0x957   :  { %1701 = vst.msk [vmem:[%s2514_s4] sm:$0xff] %vm1700_vm6, %v1696_v16 }
 0x95c   :  { %v2194_v19 = vpop.eup %2193 }
 0x95d   :  { %v2196_v20 = vpop.eup %2195  ;;  %v1699_v21 = vsel %vm1695_vm5, %v2194_v19, %v1690_v17 }
 0x95e   :  { %1704 = vst.msk [vmem:[%s2514_s4 + $0x18] sm:$0xff] %vm1700_vm6, %v1699_v21  ;;  %v1698_v22 = vsel %vm1695_vm5, %v2196_v20, %v1688_v18 }
 0x95f   :  { %1703 = vst.msk [vmem:[%s2514_s4 + $0x10] sm:$0xff] %vm1700_vm6, %v1698_v22 }

</bundles_post_ra>
